<compile_context>
chip_gen: v7x
topology: tpu7x:2x2x1
jax: 0.10.0
libtpu: 0.0.40
codegen_flags: <defaults>
</compile_context>

<pallas_src>
import jax
import jax.numpy as jnp
from jax.experimental import pallas as pl
from jax.experimental.pallas import tpu as pltpu


def encoder_kernel(
    x_ref,        # [B, D_in]
    w1_ref,       # [D_in, L1]
    bn1_ref,      # [2, L1]   row 0 = gamma1, row 1 = beta1
    w2_ref,       # [L1, L2]
    bn2_ref,      # [2, L2]   row 0 = gamma2, row 1 = beta2
    wh_ref,       # [L2, Hpad]  fused (mean | logvar | zero-pad) head weight
    bh_ref,       # [1, Hpad]   fused head bias
    out_ref,      # [B, Hpad]   fused (mean | logvar | pad) output
):
    eps = 1e-5
    x = x_ref[...].astype(jnp.float32)

    # ---- Linear 1 (bias dropped: cancelled by BN) + BatchNorm1d (batch stats) + ReLU ----
    h1 = jnp.dot(x, w1_ref[...], preferred_element_type=jnp.float32)
    mu1 = jnp.mean(h1, axis=0, keepdims=True)
    msq1 = jnp.mean(h1 * h1, axis=0, keepdims=True)
    var1 = msq1 - mu1 * mu1                       # biased variance (PyTorch BN), single pass
    bn1 = bn1_ref[...]
    h1 = (h1 - mu1) * jax.lax.rsqrt(var1 + eps) * bn1[0:1, :] + bn1[1:2, :]
    h1 = jnp.maximum(h1, 0.0)

    # ---- Linear 2 (bias dropped) + BatchNorm1d (batch stats) + ReLU ----
    h2 = jnp.dot(h1, w2_ref[...], preferred_element_type=jnp.float32)
    mu2 = jnp.mean(h2, axis=0, keepdims=True)
    msq2 = jnp.mean(h2 * h2, axis=0, keepdims=True)
    var2 = msq2 - mu2 * mu2
    bn2 = bn2_ref[...]
    h2 = (h2 - mu2) * jax.lax.rsqrt(var2 + eps) * bn2[0:1, :] + bn2[1:2, :]
    h2 = jnp.maximum(h2, 0.0)

    # ---- fused mean|logvar head: one matmul, one lane-dense store ----
    out = jnp.dot(h2, wh_ref[...], preferred_element_type=jnp.float32) + bh_ref[...]
    out_ref[...] = out.astype(out_ref.dtype)


def _round_up(n, m):
    return ((n + m - 1) // m) * m


def encoder_forward(x_img, params):
    """x_img: [B, C, H, W] (NCHW).  Returns (mean, logvar), each [B, latent]."""
    B = x_img.shape[0]
    x = x_img.reshape(B, -1).astype(jnp.float32)   # x.view(B, -1)

    (w1, b1, g1, be1, w2, b2, g2, be2, wm, bm, wl, bl) = params
    Z = wm.shape[1]
    L2 = wm.shape[0]

    # b1 / b2 are intentionally dropped: a constant per-feature shift before BatchNorm
    # is removed exactly by the batch-mean subtraction.
    del b1, b2

    # Pack BN affine params: [2, N] slabs (row 0 gamma, row 1 beta).
    bn1 = jnp.concatenate([g1, be1], axis=0)       # [2, L1]
    bn2 = jnp.concatenate([g2, be2], axis=0)       # [2, L2]

    # Fuse mean/logvar heads and pad the fused width to a multiple of 128 lanes so the
    # single output store is unmasked (lane-dense out).
    Hpad = _round_up(2 * Z, 128)
    wh = jnp.zeros((L2, Hpad), jnp.float32).at[:, : 2 * Z].set(
        jnp.concatenate([wm, wl], axis=1))
    bh = jnp.zeros((1, Hpad), jnp.float32).at[:, : 2 * Z].set(
        jnp.concatenate([bm, bl], axis=1))

    vmem = pl.BlockSpec(memory_space=pltpu.VMEM)
    out = pl.pallas_call(
        encoder_kernel,
        out_shape=jax.ShapeDtypeStruct((B, Hpad), jnp.float32),
        in_specs=[vmem] * 7,
        out_specs=vmem,
        compiler_params=pltpu.CompilerParams(vmem_limit_bytes=32 * 1024 * 1024),
    )(x, w1, bn1, w2, bn2, wh, bh)

    # TODO(synk): for real encoder sizes (e.g. 784x512x256), cast matmul operands to
    # bf16 (keeping f32 accumulation), pad hidden widths to multiples of 128, and add a
    # batch grid (with a two-pass / accumulator BatchNorm) sized for v7x's 64 MiB VMEM
    # with a "parallel" batch axis for the second TensorCore.
    mean = out[:, :Z]
    logvar = out[:, Z: 2 * Z]
    return mean, logvar


def make_params(key, input_size, lin1_size, lin2_size, latent_size):
    """Deterministic init mimicking PyTorch defaults (Linear: U(-1/sqrt(fan_in), +),
    BatchNorm: gamma=1, beta=0). Linear weights stored transposed as [in, out]."""
    ks = jax.random.split(key, 8)

    def linear(kw, kb, fan_in, fan_out):
        bound = 1.0 / jnp.sqrt(fan_in)
        w = jax.random.uniform(kw, (fan_in, fan_out), jnp.float32, -bound, bound)
        b = jax.random.uniform(kb, (1, fan_out), jnp.float32, -bound, bound)
        return w, b

    w1, b1 = linear(ks[0], ks[1], input_size, lin1_size)
    w2, b2 = linear(ks[2], ks[3], lin1_size, lin2_size)
    wm, bm = linear(ks[4], ks[5], lin2_size, latent_size)
    wl, bl = linear(ks[6], ks[7], lin2_size, latent_size)

    g1 = jnp.ones((1, lin1_size), jnp.float32)
    be1 = jnp.zeros((1, lin1_size), jnp.float32)
    g2 = jnp.ones((1, lin2_size), jnp.float32)
    be2 = jnp.zeros((1, lin2_size), jnp.float32)

    return (w1, b1, g1, be1, w2, b2, g2, be2, wm, bm, wl, bl)


def reference_forward(x_img, params):
    """Pure-JAX reference with the *original* (unfused, bias-including) math."""
    (w1, b1, g1, be1, w2, b2, g2, be2, wm, bm, wl, bl) = params
    eps = 1e-5
    x = x_img.reshape(x_img.shape[0], -1)

    h = x @ w1 + b1
    h = (h - h.mean(0, keepdims=True)) / jnp.sqrt(h.var(0, keepdims=True) + eps) * g1 + be1
    h = jnp.maximum(h, 0.0)
    h = h @ w2 + b2
    h = (h - h.mean(0, keepdims=True)) / jnp.sqrt(h.var(0, keepdims=True) + eps) * g2 + be2
    h = jnp.maximum(h, 0.0)
    return h @ wm + bm, h @ wl + bl


if __name__ == "__main__":
    # Small, module-consistent shapes: x is NCHW [8, 1, 8, 8] -> input_size = 64.
    B, C, H, W = 8, 1, 8, 8
    input_size = C * H * W          # 64
    lin1_size, lin2_size, latent_size = 32, 32, 16

    key = jax.random.PRNGKey(0)
    kx, kp = jax.random.split(key)
    x_img = jax.random.normal(kx, (B, C, H, W), jnp.float32)
    params = make_params(kp, input_size, lin1_size, lin2_size, latent_size)

    mean, logvar = encoder_forward(x_img, params)
    mean = jax.block_until_ready(mean)
    logvar = jax.block_until_ready(logvar)

    mean_ref, logvar_ref = reference_forward(x_img, params)
    assert mean.shape == (B, latent_size) and logvar.shape == (B, latent_size)
    assert jnp.allclose(mean, mean_ref, atol=1e-4, rtol=1e-4)
    assert jnp.allclose(logvar, logvar_ref, atol=1e-4, rtol=1e-4)

    print("KERNEL_OK")
</pallas_src>

<mosaic_0001>
module attributes {stable_mosaic.version = 11 : i64} {
  func.func @encoder_kernel(%arg0: memref<8x64xf32, #tpu.memory_space<vmem>>, %arg1: memref<64x32xf32, #tpu.memory_space<vmem>>, %arg2: memref<2x32xf32, #tpu.memory_space<vmem>>, %arg3: memref<32x32xf32, #tpu.memory_space<vmem>>, %arg4: memref<2x32xf32, #tpu.memory_space<vmem>>, %arg5: memref<32x128xf32, #tpu.memory_space<vmem>>, %arg6: memref<1x128xf32, #tpu.memory_space<vmem>>, %arg7: memref<8x128xf32, #tpu.memory_space<vmem>>) attributes {dimension_semantics = [], scalar_prefetch = 0 : i64, scratch_operands = 0 : i64, tpu.core_type = #tpu.core_type<tc>} {
    %c0 = arith.constant 0 : index
    %c0_0 = arith.constant 0 : index
    %0 = vector.load %arg0[%c0, %c0_0] : memref<8x64xf32, #tpu.memory_space<vmem>>, vector<8x64xf32>
    %c0_1 = arith.constant 0 : index
    %c0_2 = arith.constant 0 : index
    %1 = vector.load %arg1[%c0_1, %c0_2] : memref<64x32xf32, #tpu.memory_space<vmem>>, vector<64x32xf32>
    %cst = arith.constant dense<0.000000e+00> : vector<8x32xf32>
    %2 = tpu.matmul %0, %1, %cst {dimension_numbers = #tpu.dot_dimension_numbers<[1], [0], [0], [1], [0, 0, 1, 1], [], []>} : vector<8x64xf32>, vector<64x32xf32>, vector<8x32xf32> -> vector<8x32xf32>
    %cst_3 = arith.constant dense<0.000000e+00> : vector<32xf32>
    %3 = vector.multi_reduction <add>, %2, %cst_3 [0] : vector<8x32xf32> to vector<32xf32>
    %4 = vector.shape_cast %3 : vector<32xf32> to vector<1x32xf32>
    %cst_4 = arith.constant 8.000000e+00 : f32
    %5 = vector.broadcast %cst_4 : f32 to vector<1x32xf32>
    %6 = arith.divf %4, %5 : vector<1x32xf32>
    %7 = arith.mulf %2, %2 : vector<8x32xf32>
    %cst_5 = arith.constant dense<0.000000e+00> : vector<32xf32>
    %8 = vector.multi_reduction <add>, %7, %cst_5 [0] : vector<8x32xf32> to vector<32xf32>
    %9 = vector.shape_cast %8 : vector<32xf32> to vector<1x32xf32>
    %cst_6 = arith.constant 8.000000e+00 : f32
    %10 = vector.broadcast %cst_6 : f32 to vector<1x32xf32>
    %11 = arith.divf %9, %10 : vector<1x32xf32>
    %12 = arith.mulf %6, %6 : vector<1x32xf32>
    %13 = arith.subf %11, %12 : vector<1x32xf32>
    %c0_7 = arith.constant 0 : index
    %c0_8 = arith.constant 0 : index
    %14 = vector.load %arg2[%c0_7, %c0_8] : memref<2x32xf32, #tpu.memory_space<vmem>>, vector<2x32xf32>
    %15 = vector.broadcast %6 : vector<1x32xf32> to vector<8x32xf32>
    %16 = arith.subf %2, %15 : vector<8x32xf32>
    %cst_9 = arith.constant 9.99999974E-6 : f32
    %17 = vector.broadcast %cst_9 : f32 to vector<1x32xf32>
    %18 = arith.addf %13, %17 : vector<1x32xf32>
    %19 = math.rsqrt %18 : vector<1x32xf32>
    %20 = vector.broadcast %19 : vector<1x32xf32> to vector<8x32xf32>
    %21 = arith.mulf %16, %20 : vector<8x32xf32>
    %22 = vector.extract_strided_slice %14 {offsets = [0, 0], sizes = [1, 32], strides = [1, 1]} : vector<2x32xf32> to vector<1x32xf32>
    %23 = vector.broadcast %22 : vector<1x32xf32> to vector<8x32xf32>
    %24 = arith.mulf %21, %23 : vector<8x32xf32>
    %25 = vector.extract_strided_slice %14 {offsets = [1, 0], sizes = [1, 32], strides = [1, 1]} : vector<2x32xf32> to vector<1x32xf32>
    %26 = vector.broadcast %25 : vector<1x32xf32> to vector<8x32xf32>
    %27 = arith.addf %24, %26 : vector<8x32xf32>
    %cst_10 = arith.constant 0.000000e+00 : f32
    %28 = vector.broadcast %cst_10 : f32 to vector<8x32xf32>
    %29 = arith.maximumf %27, %28 : vector<8x32xf32>
    %c0_11 = arith.constant 0 : index
    %c0_12 = arith.constant 0 : index
    %30 = vector.load %arg3[%c0_11, %c0_12] : memref<32x32xf32, #tpu.memory_space<vmem>>, vector<32x32xf32>
    %cst_13 = arith.constant dense<0.000000e+00> : vector<8x32xf32>
    %31 = tpu.matmul %29, %30, %cst_13 {dimension_numbers = #tpu.dot_dimension_numbers<[1], [0], [0], [1], [0, 0, 1, 1], [], []>} : vector<8x32xf32>, vector<32x32xf32>, vector<8x32xf32> -> vector<8x32xf32>
    %cst_14 = arith.constant dense<0.000000e+00> : vector<32xf32>
    %32 = vector.multi_reduction <add>, %31, %cst_14 [0] : vector<8x32xf32> to vector<32xf32>
    %33 = vector.shape_cast %32 : vector<32xf32> to vector<1x32xf32>
    %cst_15 = arith.constant 8.000000e+00 : f32
    %34 = vector.broadcast %cst_15 : f32 to vector<1x32xf32>
    %35 = arith.divf %33, %34 : vector<1x32xf32>
    %36 = arith.mulf %31, %31 : vector<8x32xf32>
    %cst_16 = arith.constant dense<0.000000e+00> : vector<32xf32>
    %37 = vector.multi_reduction <add>, %36, %cst_16 [0] : vector<8x32xf32> to vector<32xf32>
    %38 = vector.shape_cast %37 : vector<32xf32> to vector<1x32xf32>
    %cst_17 = arith.constant 8.000000e+00 : f32
    %39 = vector.broadcast %cst_17 : f32 to vector<1x32xf32>
    %40 = arith.divf %38, %39 : vector<1x32xf32>
    %41 = arith.mulf %35, %35 : vector<1x32xf32>
    %42 = arith.subf %40, %41 : vector<1x32xf32>
    %c0_18 = arith.constant 0 : index
    %c0_19 = arith.constant 0 : index
    %43 = vector.load %arg4[%c0_18, %c0_19] : memref<2x32xf32, #tpu.memory_space<vmem>>, vector<2x32xf32>
    %44 = vector.broadcast %35 : vector<1x32xf32> to vector<8x32xf32>
    %45 = arith.subf %31, %44 : vector<8x32xf32>
    %cst_20 = arith.constant 9.99999974E-6 : f32
    %46 = vector.broadcast %cst_20 : f32 to vector<1x32xf32>
    %47 = arith.addf %42, %46 : vector<1x32xf32>
    %48 = math.rsqrt %47 : vector<1x32xf32>
    %49 = vector.broadcast %48 : vector<1x32xf32> to vector<8x32xf32>
    %50 = arith.mulf %45, %49 : vector<8x32xf32>
    %51 = vector.extract_strided_slice %43 {offsets = [0, 0], sizes = [1, 32], strides = [1, 1]} : vector<2x32xf32> to vector<1x32xf32>
    %52 = vector.broadcast %51 : vector<1x32xf32> to vector<8x32xf32>
    %53 = arith.mulf %50, %52 : vector<8x32xf32>
    %54 = vector.extract_strided_slice %43 {offsets = [1, 0], sizes = [1, 32], strides = [1, 1]} : vector<2x32xf32> to vector<1x32xf32>
    %55 = vector.broadcast %54 : vector<1x32xf32> to vector<8x32xf32>
    %56 = arith.addf %53, %55 : vector<8x32xf32>
    %cst_21 = arith.constant 0.000000e+00 : f32
    %57 = vector.broadcast %cst_21 : f32 to vector<8x32xf32>
    %58 = arith.maximumf %56, %57 : vector<8x32xf32>
    %c0_22 = arith.constant 0 : index
    %c0_23 = arith.constant 0 : index
    %59 = vector.load %arg5[%c0_22, %c0_23] : memref<32x128xf32, #tpu.memory_space<vmem>>, vector<32x128xf32>
    %cst_24 = arith.constant dense<0.000000e+00> : vector<8x128xf32>
    %60 = tpu.matmul %58, %59, %cst_24 {dimension_numbers = #tpu.dot_dimension_numbers<[1], [0], [0], [1], [0, 0, 1, 1], [], []>} : vector<8x32xf32>, vector<32x128xf32>, vector<8x128xf32> -> vector<8x128xf32>
    %c0_25 = arith.constant 0 : index
    %c0_26 = arith.constant 0 : index
    %61 = vector.load %arg6[%c0_25, %c0_26] : memref<1x128xf32, #tpu.memory_space<vmem>>, vector<1x128xf32>
    %62 = vector.broadcast %61 : vector<1x128xf32> to vector<8x128xf32>
    %63 = arith.addf %60, %62 : vector<8x128xf32>
    %c0_27 = arith.constant 0 : index
    %c0_28 = arith.constant 0 : index
    %64 = vector.load %arg7[%c0_27, %c0_28] : memref<8x128xf32, #tpu.memory_space<vmem>>, vector<8x128xf32>
    tpu.vector_store %arg7[%c0_27, %c0_28], %63 {strides = array<i32>} : memref<8x128xf32, #tpu.memory_space<vmem>>, vector<8x128xf32>,
    return
  }
}

</mosaic_0001>

<bundles_post_ra>
// kernel: tpu_custom_call.1
= control target key start
LH: loop header
LB: loop body
LE: loop exit
PB: predicated region body
PF: predicated region fallthrough
CT: control target
= control target key end

     0   :  { %v478_v3 = vmov 0.0|0.0   ;;  %vm479_vm0 = vmmov 0   ;;  %v480_v6 = vmov 0.0   ;;  %s614_s0 = inlined_call_operand.vmem [shape: f32[8,64], index: 0, kind: input, shape index: {}]   ;;  %s615_s1 = inlined_call_operand.vmem [shape: f32[64,32], index: 1, kind: input, shape index: {}]   ;;  %s616_s2 = inlined_call_operand.vmem [shape: f32[2,32], index: 2, kind: input, shape index: {}]   ;;  %s617_s3 = inlined_call_operand.vmem [shape: f32[32,32], index: 3, kind: input, shape index: {}]   ;;  %s618_s4 = inlined_call_operand.vmem [shape: f32[2,32], index: 4, kind: input, shape index: {}]   ;;  %s619_s5 = inlined_call_operand.vmem [shape: f32[32,128], index: 5, kind: input, shape index: {}]   ;;  %s620_s6 = inlined_call_operand.vmem [shape: f32[1,128], index: 6, kind: input, shape index: {}]   ;;  %s621_s7 = inlined_call_operand.hbm [shape: f32[8,128], index: 7, kind: output, shape index: {}]  }
   0x1   :  { %v28_v0 = vld [vmem:[%s615_s1] sm:$0xff]  ;;  %v29_v1 = vld [vmem:[%s615_s1 + $0x8] sm:$0xff]  ;;  %v30_v2 = vld [vmem:[%s615_s1 + $0x10] sm:$0xff]  ;;  %422 = vmatprep.subr.bf16.mxu0 %v478_v3  ;;  %397 = vmatprep.mubr.msk.f32.mxu0 %vm479_vm0, %v480_v6 }
   0x2   :  { %v423_v4 = vpack.c.bf16 %v29_v1, %v28_v0  ;;  %v31_v5 = vld [vmem:[%s615_s1 + $0x18] sm:$0xff]  ;;  %434 = vmatprep.subr.bf16.mxu1 %v478_v3  ;;  %408 = vmatprep.mubr.msk.f32.mxu1 %vm479_vm0, %v480_v6 }
   0x3   :  { %v426_v7 = vpack.c.bf16 %v31_v5, %v30_v2 }
   0x4   :  { %424 = vmatpush3.bf16.msra.mxu0 %v423_v4 }
   0x5   :  { %12 = vsyncpa [#allocation3], 0  ;;  %425 = vmatprep.subr.bf16.mxu0 %v478_v3  ;;  %v32_v8 = vld [vmem:[%s615_s1 + $0x20] sm:$0xff]  ;;  %v33_v9 = vld [vmem:[%s615_s1 + $0x28] sm:$0xff]  ;;  %vm36_vm1 = vcmask 523264   ;;  %vm110_vm2 = vcmask 261120   ;;  %v136_v42 = vlaneseq }
   0x6   :  { %v429_v10 = vpack.c.bf16 %v33_v9, %v32_v8  ;;  %v34_v11 = vld [vmem:[%s615_s1 + $0x30] sm:$0xff]  ;;  %v35_v12 = vld [vmem:[%s615_s1 + $0x38] sm:$0xff]  ;;  %v27_v14 = vld [vmem:[%s614_s0] sm:$0xff]  ;;  %s481_s13 = smov [#allocation2]  }
   0x7   :  { %v432_v13 = vpack.c.bf16 %v35_v12, %v34_v11  ;;  %v147_v15 = vld [vmem:[%s617_s3] sm:$0xff]  ;;  %v148_v16 = vld [vmem:[%s617_s3 + $0x8] sm:$0xff]  ;;  %v149_v18 = vld [vmem:[%s617_s3 + $0x10] sm:$0xff]  ;;  %v137_v44 = vshrl.u32 %v136_v42, 7  ;;  %s350_s14 = sshll.u32 %s481_s13, 4  ;;  %s351_s14 = int_to_ptr.vmem [resolvable:$true] %s350_s14 }
   0x8   :  { %427 = vmatpush3.bf16.msra.mxu0 %v426_v7  ;;  %v435_v17 = vpack.c.bf16 %v148_v16, %v147_v15  ;;  %v150_v19 = vld [vmem:[%s617_s3 + $0x18] sm:$0xff]  ;;  %v131_v46 = vld [vmem:[%s616_s2] sm:$0x3]  ;;  %v260_v57 = vld [vmem:[%s619_s5 + $0x8] sm:$0xff]  ;;  %p459_p1 = scmp.lt.s32.totalorder %s351_s14, %s351_s14 }
   0x9   :  { %428 = vmatprep.subr.bf16.mxu0 %v478_v3  ;;  %v438_v20 = vpack.c.bf16 %v150_v19, %v149_v18  ;;  %v138_v45 = vsub.s32 0, %v137_v44  ;;  %v143_v47 = vsub.s32 1, %v137_v44  ;;  %v259_v56 = vld [vmem:[%s619_s5] sm:$0xff]  ;;  %v261_v59 = vld [vmem:[%s619_s5 + $0x10] sm:$0xff]  ;;  %v262_v60 = vld [vmem:[%s619_s5 + $0x18] sm:$0xff] }
   0xa   :  { %436 = vmatpush3.bf16.msra.mxu1 %v435_v17  ;;  %v441_v58 = vpack.c.bf16 %v260_v57, %v259_v56  ;;  %v444_v61 = vpack.c.bf16 %v262_v60, %v261_v59 }
   0xb   :  { %437 = vmatprep.subr.bf16.mxu1 %v478_v3  ;;  %v139_v49 = vrot.slane %v131_v46, %v138_v45  ;;  %v144_v52 = vrot.slane %v131_v46, %v143_v47 }
   0xc   :  { %430 = vmatpush3.bf16.msra.mxu0 %v429_v10 }
   0xd   :  { %431 = vmatprep.subr.bf16.mxu0 %v478_v3 }
   0xe   :  { %439 = vmatpush3.bf16.msra.mxu1 %v438_v20  ;;  %v243_v20 = vld [vmem:[%s618_s4] sm:$0x3]  ;;  %s454_s4 = scalar_lea.vmem %s351_s14, 128 }
   0xf   :  { %440 = vmatprep.subr.bf16.mxu1 %v478_v3  ;;  %p455_p0 = scmp.ne.s32.totalorder %s351_s14, %s454_s4  ;;  %p460_p2 = scmp.lt.s32.totalorder %s454_s4, %s454_s4 }
  0x10   :  { %433 = vmatpush3.bf16.msra.mxu0 %v432_v13 }
  0x11   :  { %p461_p3 = por %p460_p2, %p459_p1 }
  0x13   :  { %398 = vmatmul.mubr.msk.f32.vlgmr.msra.gmra.mrb[0].mxu0 %vm36_vm1, %v27_v14  ;;  %p462_p4 = pnand %p461_p3, %p455_p0 }
  0xe6   :  { %v106_v21 = vpop.f32.mrb[0].mxu0 }
  0xe7   :  { %v111_v22 = vsel %vm110_vm2, %v106_v21, 0.0  ;;  %v120_v23 = vmul.f32 %v106_v21, %v106_v21  ;;  %v399_v24 = vpop.f32.mrb[1].mxu0 }
  0xe8   :  { %v112_v25 = vrot.slane %v111_v22, 4 }
  0xe9   :  { %v121_v26 = vsel %vm110_vm2, %v120_v23, 0.0 }
  0xea   :  { %v113_v27 = vadd.f32 %v112_v25, %v111_v22  ;;  %v122_v28 = vrot.slane %v121_v26, 4  ;;  %v251_v22 = vrot.slane %v243_v20, %v138_v45  ;;  %v256_v25 = vrot.slane %v243_v20, %v143_v47 }
  0xec   :  { %v114_v29 = vrot.slane %v113_v27, 2  ;;  %v123_v30 = vadd.f32 %v122_v28, %v121_v26 }
  0xee   :  { %v115_v31 = vadd.f32 %v114_v29, %v113_v27  ;;  %v124_v32 = vrot.slane %v123_v30, 2  ;;  %v360_v29 = vld [vmem:[%s620_s6] ss:$0 sm:$0xff] }
  0xf0   :  { %v116_v33 = vrot.slane %v115_v31, 1  ;;  %v125_v34 = vadd.f32 %v124_v32, %v123_v30 }
  0xf2   :  { %v117_v35 = vadd.f32 %v116_v33, %v115_v31  ;;  %v126_v36 = vrot.slane %v125_v34, 1 }
  0xf4   :  { %v119_v37 = vmul.f32 0.125, %v117_v35  ;;  %v127_v38 = vadd.f32 %v126_v36, %v125_v34 }
  0xf6   :  { %v128_v39 = vmul.f32 0.125, %v127_v38  ;;  %v129_v40 = vmul.f32 %v119_v37, %v119_v37  ;;  %v132_v48 = vsub.f32 %v106_v21, %v119_v37 }
  0xf8   :  { %v130_v41 = vsub.f32 %v128_v39, %v129_v40 }
  0xfa   :  { %v133_v43 = vadd.f32 1e-05, %v130_v41 }
  0xfc   :  { %450 = vrsqrt.f32 %v133_v43 }
 0x106   :  { %v451_v50 = vpop.eup %450 }
 0x107   :  { %v135_v51 = vmul.f32 %v451_v50, %v132_v48 }
 0x109   :  { %v140_v53 = vmul.f32 %v139_v49, %v135_v51 }
 0x10b   :  { %v145_v54 = vadd.f32 %v144_v52, %v140_v53 }
 0x10d   :  { %v146_v55 = vmax.f32 %v145_v54, 0.0 }
 0x10f   :  { %409 = vmatmul.mubr.msk.f32.vlgmr.msra.gmra.mrb[0].mxu1 %vm110_vm2, %v146_v55 }
 0x110   :  { %419 = vmatprep.mubr.msk.f32.mxu1 %vm479_vm0, %v480_v6  ;;  %442 = vmatpush3.bf16.msra.mxu1 %v441_v58 }
 0x111   :  { %443 = vmatprep.subr.bf16.mxu1 %v478_v3 }
 0x114   :  { %445 = vmatpush3.bf16.msra.mxu1 %v444_v61 }
 0x1e2   :  { %v220_v62 = vpop.f32.mrb[0].mxu1 }
 0x1e3   :  { %v224_v63 = vsel %vm110_vm2, %v220_v62, 0.0  ;;  %v232_v0 = vmul.f32 %v220_v62, %v220_v62  ;;  %v410_v1 = vpop.f32.mrb[1].mxu1 }
 0x1e4   :  { %v225_v2 = vrot.slane %v224_v63, 4 }
 0x1e5   :  { %v233_v4 = vsel %vm110_vm2, %v232_v0, 0.0 }
 0x1e6   :  { %v226_v5 = vadd.f32 %v225_v2, %v224_v63  ;;  %v234_v3 = vrot.slane %v233_v4, 4 }
 0x1e8   :  { %v227_v6 = vrot.slane %v226_v5, 2  ;;  %v235_v7 = vadd.f32 %v234_v3, %v233_v4 }
 0x1ea   :  { %v228_v8 = vadd.f32 %v227_v6, %v226_v5  ;;  %v236_v9 = vrot.slane %v235_v7, 2 }
 0x1ec   :  { %v229_v10 = vrot.slane %v228_v8, 1  ;;  %v237_v11 = vadd.f32 %v236_v9, %v235_v7 }
 0x1ee   :  { %v230_v12 = vadd.f32 %v229_v10, %v228_v8  ;;  %v238_v13 = vrot.slane %v237_v11, 1 }
 0x1f0   :  { %v231_v14 = vmul.f32 0.125, %v230_v12  ;;  %v239_v15 = vadd.f32 %v238_v13, %v237_v11 }
 0x1f2   :  { %v240_v16 = vmul.f32 0.125, %v239_v15  ;;  %v241_v17 = vmul.f32 %v231_v14, %v231_v14  ;;  %v244_v21 = vsub.f32 %v220_v62, %v231_v14 }
 0x1f4   :  { %v242_v18 = vsub.f32 %v240_v16, %v241_v17 }
 0x1f6   :  { %v245_v19 = vadd.f32 1e-05, %v242_v18 }
 0x1f8   :  { %452 = vrsqrt.f32 %v245_v19 }
 0x202   :  { %v453_v23 = vpop.eup %452 }
 0x203   :  { %v247_v24 = vmul.f32 %v453_v23, %v244_v21 }
 0x205   :  { %v252_v26 = vmul.f32 %v251_v22, %v247_v24 }
 0x207   :  { %v257_v27 = vadd.f32 %v256_v25, %v252_v26 }
 0x209   :  { %v258_v28 = vmax.f32 %v257_v27, 0.0 }
 0x20b   :  { %420 = vmatmul.mubr.msk.f32.vlgmr.msra.gmra.mrb[2].mxu1 %vm110_vm2, %v258_v28 }
 0x2de   :  { %v339_v30 = vpop.f32.mrb[2].mxu1 }
 0x2df   :  { %v340_v31 = vadd.f32 %v360_v29, %v339_v30  ;;  %v421_v32 = vpop.f32.mrb[3].mxu1 }
 0x2e1   :  { %343 = vst [vmem:[#allocation2] sm:$0xff] %v340_v31 }
 0x2e2   :  { %465 = shalt.err (!%p462_p4)
}
 0x2e3   :  { %s466_s17 = scalar_lea.hbm %s621_s7, 128 }
 0x2e4   :  { %p467_p5 = scmp.ne.s32.totalorder %s621_s7, %s466_s17  ;;  %p470_p6 = scmp.lt.u32.totalorder %s466_s17, %s621_s7 }
 0x2e6   :  { %p472_p7 = pnand %p470_p6, %p467_p5 }
 0x2e8   :  { %475 = shalt.err (!%p472_p7)
}
 0x2e9   :  { %353 = dma.vmem_to_hbm [thread:$0]  %s351_s14, 128, %s621_s7, [#allocation3]  }
 0x2ea   :  { %476 = dma.done.wait [#allocation3], 128  }
 0x2eb   :  { %477 = vsyncadd [#allocation3], 4294967168 }
 0x2ec   :  { %357 = vsyncpa [#allocation3], 1 }

</bundles_post_ra>
